<compile_context>
chip_gen: v5e
topology: v5e:2x2
jax: 0.10.0
libtpu: 0.0.40
codegen_flags: <defaults>
</compile_context>

<pallas_src>
import math

import numpy as np
import jax
import jax.numpy as jnp
from jax import lax
from jax.experimental import pallas as pl
from jax.experimental.pallas import tpu as pltpu

BN_EPS = 1e-5
NEG_BIG = -9.0e15


def _sigmoid(v):
    return 1.0 / (1.0 + jnp.exp(-v))


def _bn_train(v, gamma, beta):
    """BatchNorm1d with training-mode batch stats; per-channel over axis 0 of (R, C)."""
    mu = jnp.mean(v, axis=0, keepdims=True)
    var = jnp.mean((v - mu) * (v - mu), axis=0, keepdims=True)
    return (v - mu) * lax.rsqrt(var + BN_EPS) * gamma + beta


def _res_gconv_attention_kernel(
        x_ref,                      # (R, C)      concatenated input == residual, R = B*J
        d1_ref, ab1_ref,            # (R, 1), (TR, TR)  gconv1 adjacency: diag col / off-diag tile
        w1_ref,                     # (2C, H)     gconv1 stacked [W0 ; W1]
        bn1_ref,                    # (3, H)      rows: bias, gamma, beta
        d2_ref, ab2_ref,            # (R, 1), (TR, TR)
        w2_ref,                     # (H, 2C)     gconv2 fused [W0 | W1]
        bn2_ref,                    # (3, C)      rows: bias, gamma, beta (outer BN)
        ws1_ref, bs1_ref,           # (C, C//4), (1, C//4)   attention squeeze MLP
        ws2_ref, bs2_ref,           # (C//4, J), (1, J)
        pool_ref,                   # (B, R)      mean-over-joints pooling matrix
        pe_ref,                     # (R, B)      batch one-hot expander
        msel_ref,                   # (R, J)      joint one-hot selector
        out_ref):                   # (R, C)
    f32 = jnp.float32
    x = x_ref[...]
    rows = x.shape[0]
    tile_rows = ab1_ref.shape[0]          # T*J, multiple of 8 by construction
    num_tiles = rows // tile_rows         # static Python int

    def offdiag(ab_ref, v):
        """(I_nt (x) A_off) @ v without materializing the O(B^2) block-diagonal."""
        ab = ab_ref[...]
        if num_tiles == 1:
            return jnp.dot(ab, v, preferred_element_type=f32)
        parts = [jnp.dot(ab, v[t * tile_rows:(t + 1) * tile_rows, :],
                         preferred_element_type=f32)
                 for t in range(num_tiles)]
        return jnp.concatenate(parts, axis=0)

    # ---- gconv1: SemGraphConv + BN (batch stats) + ReLU -------------------
    # diag.*(x@W0) + A@(x@W1) == [diag.*x | A@x] @ [W0 ; W1]  (128-aligned lane concat)
    lhs1 = jnp.concatenate([d1_ref[...] * x, offdiag(ab1_ref, x)], axis=-1)   # (R, 2C)
    g = jnp.dot(lhs1, w1_ref[...], preferred_element_type=f32) + bn1_ref[0:1, :]
    g = jnp.maximum(_bn_train(g, bn1_ref[1:2, :], bn1_ref[2:3, :]), 0.0)
    # TODO(synk): dropout (p_dropout) omitted -- identity for p_dropout=None / eval mode.

    # ---- gconv2 (no BN): fused projection, 128-aligned output split -------
    cout = bn2_ref.shape[1]
    h = jnp.dot(g, w2_ref[...], preferred_element_type=f32)                  # (R, 2C)
    g2 = (d2_ref[...] * h[:, :cout]
          + offdiag(ab2_ref, h[:, cout:])
          + bn2_ref[0:1, :])

    # ---- residual add + BN + ReLU -----------------------------------------
    s = jnp.maximum(_bn_train(x + g2, bn2_ref[1:2, :], bn2_ref[2:3, :]), 0.0)

    # ---- Node_Attention (SE): avg over joints -> MLP -> sigmoid gate -------
    pooled = jnp.dot(pool_ref[...], s, preferred_element_type=f32)           # (B, C)
    z = jnp.maximum(jnp.dot(pooled, ws1_ref[...], preferred_element_type=f32)
                    + bs1_ref[...], 0.0)                                     # (B, C//4)
    att = _sigmoid(jnp.dot(z, ws2_ref[...], preferred_element_type=f32)
                   + bs2_ref[...])                                           # (B, J)
    # per-row gate att[r // J, r % J], built without any lane->sublane relayout:
    att_rows = jnp.dot(pe_ref[...], att, preferred_element_type=f32)         # (R, J)
    gate = jnp.sum(att_rows * msel_ref[...], axis=1, keepdims=True)          # (R, 1)

    out_ref[...] = s * (1.0 + gate)                                          # x + x*att


_STATIC_ORDER = ('d1', 'ab1', 'w1', 'bn1', 'd2', 'ab2', 'w2', 'bn2',
                 'ws1', 'bs1', 'ws2', 'bs2', 'pool', 'pe', 'msel')


def prepare_static_operands(p, B, J):
    """Build all model-derived constants ONCE (hoisted out of the per-step path)."""
    eyeJ = jnp.eye(J, dtype=jnp.float32)
    eyeB = jnp.eye(B, dtype=jnp.float32)

    # Batch tile T: smallest divisor of B whose tile height T*J is sublane-aligned
    # (multiple of 8) so in-kernel row slices are free; fall back to the whole batch.
    cands = [t for t in range(1, B + 1) if B % t == 0 and (t * J) % 8 == 0]
    T = min(cands) if cands else B
    eyeT = jnp.eye(T, dtype=jnp.float32)

    def adj_pieces(adj_logits):
        a = jax.nn.softmax(adj_logits, axis=1)
        d_col = jnp.tile(jnp.diagonal(a), B)[:, None]          # (B*J, 1)   O(B)
        ab_tile = jnp.kron(eyeT, a * (1.0 - eyeJ))             # (T*J, T*J) O(1) in B
        return d_col, ab_tile

    d1, ab1 = adj_pieces(p['adj1'])
    d2, ab2 = adj_pieces(p['adj2'])

    ops = dict(
        d1=d1, ab1=ab1,
        w1=jnp.concatenate([p['W1'][0], p['W1'][1]], axis=0),          # (2*Cin, H)
        bn1=jnp.concatenate([p['b1'], p['gamma1'], p['beta1']], axis=0),
        d2=d2, ab2=ab2,
        w2=jnp.concatenate([p['W2'][0], p['W2'][1]], axis=1),          # (H, 2*Cout)
        bn2=jnp.concatenate([p['b2'], p['gamma_f'], p['beta_f']], axis=0),
        ws1=p['Ws1'], bs1=p['bs1'], ws2=p['Ws2'], bs2=p['bs2'],
        pool=jnp.repeat(eyeB, J, axis=1) / float(J),                   # (B, B*J)
        pe=jnp.repeat(eyeB, J, axis=0),                                # (B*J, B)
        msel=jnp.tile(eyeJ, (B, 1)),                                   # (B*J, J)
    )
    return jax.device_put(ops)


@jax.jit
def res_graph_conv_attention_forward(x, joint_features, ops):
    """x: (B, J, Cx); joint_features: (B, F, J) or None. Returns (B, J, Cout)."""
    if joint_features is not None:
        x = jnp.concatenate([jnp.swapaxes(joint_features, 1, 2), x], axis=2)
    B, J, Cin = x.shape
    Cout = ops['bn2'].shape[1]
    assert Cin == Cout, "residual add requires concatenated input width == output_dim"
    assert ops['ws2'].shape[1] == J, "Node_Attention emits one gate per joint (J must be 12)"
    assert ops['pe'].shape == (B * J, B), "static operands were prepared for a different batch"

    x2d = x.reshape(B * J, Cin)                                        # row r = b*J + j
    vmem = pl.BlockSpec(memory_space=pltpu.MemorySpace.VMEM)
    out2d = pl.pallas_call(
        _res_gconv_attention_kernel,
        out_shape=jax.ShapeDtypeStruct((B * J, Cout), jnp.float32),
        in_specs=[vmem] * (1 + len(_STATIC_ORDER)),
        out_specs=vmem,
    )(x2d, *(ops[k] for k in _STATIC_ORDER))
    return out2d.reshape(B, J, Cout)


def _reference(x, joint_features, p):
    """Pure-JAX mirror of _ResGraphConv_Attention.forward (train-mode BN, no dropout)."""
    if joint_features is not None:
        x = jnp.concatenate([jnp.swapaxes(joint_features, 1, 2), x], axis=2)
    residual = x
    J = x.shape[1]
    eye = jnp.eye(J, dtype=jnp.float32)

    def semgconv(inp, W, bias, adj_logits):
        h0 = jnp.einsum('bjc,cd->bjd', inp, W[0])
        h1 = jnp.einsum('bjc,cd->bjd', inp, W[1])
        a = jax.nn.softmax(adj_logits, axis=1)
        return (jnp.einsum('jk,bkd->bjd', a * eye, h0)
                + jnp.einsum('jk,bkd->bjd', a * (1.0 - eye), h1) + bias)

    def bn(v, gamma, beta):
        mu = v.mean(axis=(0, 1), keepdims=True)
        var = ((v - mu) ** 2).mean(axis=(0, 1), keepdims=True)
        return (v - mu) / jnp.sqrt(var + BN_EPS) * gamma + beta

    out = jnp.maximum(bn(semgconv(x, p['W1'], p['b1'], p['adj1']),
                         p['gamma1'], p['beta1']), 0.0)
    out = semgconv(out, p['W2'], p['b2'], p['adj2'])
    out = jnp.maximum(bn(residual + out, p['gamma_f'], p['beta_f']), 0.0)
    pooled = out.mean(axis=1)                                          # avg over joints
    z = jnp.maximum(pooled @ p['Ws1'] + p['bs1'], 0.0)
    att = _sigmoid(z @ p['Ws2'] + p['bs2'])                            # (B, J)
    return out * (1.0 + att[:, :, None])


if __name__ == "__main__":
    B, J = 2, 12                     # Node_Attention hard-codes 12 joint gates
    output_dim = 128                 # == residual width
    hid_dim = 128
    H = hid_dim // 2                 # gconv1 output channels
    Cq = output_dim // 4             # attention squeeze width
    Cx, Fj = 96, 32                  # x features + joint_features -> 128 after concat

    key = jax.random.PRNGKey(0)
    ks = jax.random.split(key, 19)

    # static skeleton graph over J nodes: chain + self-loops
    adj_np = np.eye(J, dtype=np.float32)
    for i in range(J - 1):
        adj_np[i, i + 1] = 1.0
        adj_np[i + 1, i] = 1.0
    rows, cols = np.nonzero(adj_np > 0)          # torch .nonzero() row-major order
    n_edges = rows.shape[0]
    rows_j, cols_j = jnp.asarray(rows), jnp.asarray(cols)

    def adj_logits(e):
        return jnp.full((J, J), NEG_BIG, jnp.float32).at[rows_j, cols_j].set(e)

    def xavier(k, shape, gain=1.414):
        bound = gain * math.sqrt(6.0 / (shape[-2] + shape[-1]))
        return jax.random.uniform(k, shape, jnp.float32, -bound, bound)

    def unif(k, shape, scale):
        return jax.random.uniform(k, shape, jnp.float32, -scale, scale)

    Cin = Cx + Fj
    params = dict(
        # gconv1: SemGraphConv(Cin -> H) + BatchNorm1d(H)
        W1=xavier(ks[0], (2, Cin, H)),
        b1=unif(ks[1], (1, H), 1.0 / math.sqrt(H)),
        adj1=adj_logits(1.0 + 0.5 * jax.random.normal(ks[2], (n_edges,), jnp.float32)),
        gamma1=1.0 + 0.1 * jax.random.normal(ks[3], (1, H), jnp.float32),
        beta1=0.1 * jax.random.normal(ks[4], (1, H), jnp.float32),
        # gconv2: SemGraphConv(H -> output_dim), no BN
        W2=xavier(ks[5], (2, H, output_dim)),
        b2=unif(ks[6], (1, output_dim), 1.0 / math.sqrt(output_dim)),
        adj2=adj_logits(1.0 + 0.5 * jax.random.normal(ks[7], (n_edges,), jnp.float32)),
        # outer BatchNorm1d(output_dim)
        gamma_f=1.0 + 0.1 * jax.random.normal(ks[8], (1, output_dim), jnp.float32),
        beta_f=0.1 * jax.random.normal(ks[9], (1, output_dim), jnp.float32),
        # Node_Attention squeeze MLP: Linear(C, C//4) -> ReLU -> Linear(C//4, 12) -> Sigmoid
        Ws1=unif(ks[10], (output_dim, Cq), 1.0 / math.sqrt(output_dim)),
        bs1=unif(ks[11], (1, Cq), 1.0 / math.sqrt(output_dim)),
        Ws2=unif(ks[12], (Cq, J), 1.0 / math.sqrt(Cq)),
        bs2=unif(ks[13], (1, J), 1.0 / math.sqrt(Cq)),
    )

    # Static operands built ONCE per (model, batch size) -- not per forward call.
    ops_b2 = prepare_static_operands(params, B, J)

    x = jax.random.normal(ks[14], (B, J, Cx), jnp.float32)
    joint_features = jax.random.normal(ks[15], (B, Fj, J), jnp.float32)

    # Path 1: joint_features provided (concatenated in the wrapper, as in the module)
    out = jax.block_until_ready(res_graph_conv_attention_forward(x, joint_features, ops_b2))
    assert out.shape == (B, J, output_dim)
    np.testing.assert_allclose(np.asarray(out),
                               np.asarray(_reference(x, joint_features, params)),
                               rtol=5e-4, atol=5e-4)

    # Path 2: joint_features is None (x already has output_dim features)
    x_full = jax.random.normal(ks[16], (B, J, output_dim), jnp.float32)
    out2 = jax.block_until_ready(res_graph_conv_attention_forward(x_full, None, ops_b2))
    np.testing.assert_allclose(np.asarray(out2),
                               np.asarray(_reference(x_full, None, params)),
                               rtol=5e-4, atol=5e-4)

    # Path 3: larger batch exercising the O(B) tiled adjacency path (num_tiles > 1)
    B4 = 4
    ops_b4 = prepare_static_operands(params, B4, J)
    x4 = jax.random.normal(ks[17], (B4, J, Cx), jnp.float32)
    jf4 = jax.random.normal(ks[18], (B4, Fj, J), jnp.float32)
    out3 = jax.block_until_ready(res_graph_conv_attention_forward(x4, jf4, ops_b4))
    np.testing.assert_allclose(np.asarray(out3),
                               np.asarray(_reference(x4, jf4, params)),
                               rtol=5e-4, atol=5e-4)

    print("KERNEL_OK")
</pallas_src>

<mosaic_0001>
module attributes {stable_mosaic.version = 11 : i64} {
  func.func @_res_gconv_attention_kernel(%arg0: memref<24x128xf32, #tpu.memory_space<vmem>>, %arg1: memref<24x1xf32, #tpu.memory_space<vmem>>, %arg2: memref<24x24xf32, #tpu.memory_space<vmem>>, %arg3: memref<256x64xf32, #tpu.memory_space<vmem>>, %arg4: memref<3x64xf32, #tpu.memory_space<vmem>>, %arg5: memref<24x1xf32, #tpu.memory_space<vmem>>, %arg6: memref<24x24xf32, #tpu.memory_space<vmem>>, %arg7: memref<64x256xf32, #tpu.memory_space<vmem>>, %arg8: memref<3x128xf32, #tpu.memory_space<vmem>>, %arg9: memref<128x32xf32, #tpu.memory_space<vmem>>, %arg10: memref<1x32xf32, #tpu.memory_space<vmem>>, %arg11: memref<32x12xf32, #tpu.memory_space<vmem>>, %arg12: memref<1x12xf32, #tpu.memory_space<vmem>>, %arg13: memref<2x24xf32, #tpu.memory_space<vmem>>, %arg14: memref<24x2xf32, #tpu.memory_space<vmem>>, %arg15: memref<24x12xf32, #tpu.memory_space<vmem>>, %arg16: memref<24x128xf32, #tpu.memory_space<vmem>>) attributes {dimension_semantics = [], scalar_prefetch = 0 : i64, scratch_operands = 0 : i64, tpu.core_type = #tpu.core_type<tc>} {
    %c0 = arith.constant 0 : index
    %c0_0 = arith.constant 0 : index
    %0 = vector.load %arg0[%c0, %c0_0] : memref<24x128xf32, #tpu.memory_space<vmem>>, vector<24x128xf32>
    %c0_1 = arith.constant 0 : index
    %c0_2 = arith.constant 0 : index
    %1 = vector.load %arg1[%c0_1, %c0_2] : memref<24x1xf32, #tpu.memory_space<vmem>>, vector<24x1xf32>
    %2 = vector.broadcast %1 : vector<24x1xf32> to vector<24x128xf32>
    %3 = arith.mulf %2, %0 : vector<24x128xf32>
    %c0_3 = arith.constant 0 : index
    %c0_4 = arith.constant 0 : index
    %4 = vector.load %arg2[%c0_3, %c0_4] : memref<24x24xf32, #tpu.memory_space<vmem>>, vector<24x24xf32>
    %cst = arith.constant dense<0.000000e+00> : vector<24x128xf32>
    %5 = tpu.matmul %4, %0, %cst {dimension_numbers = #tpu.dot_dimension_numbers<[1], [0], [0], [1], [0, 0, 1, 1], [], []>} : vector<24x24xf32>, vector<24x128xf32>, vector<24x128xf32> -> vector<24x128xf32>
    %6 = tpu.concatenate %3, %5 in 1 : vector<24x128xf32>, vector<24x128xf32> -> vector<24x256xf32>
    %c0_5 = arith.constant 0 : index
    %c0_6 = arith.constant 0 : index
    %7 = vector.load %arg3[%c0_5, %c0_6] : memref<256x64xf32, #tpu.memory_space<vmem>>, vector<256x64xf32>
    %cst_7 = arith.constant dense<0.000000e+00> : vector<24x64xf32>
    %8 = tpu.matmul %6, %7, %cst_7 {dimension_numbers = #tpu.dot_dimension_numbers<[1], [0], [0], [1], [0, 0, 1, 1], [], []>} : vector<24x256xf32>, vector<256x64xf32>, vector<24x64xf32> -> vector<24x64xf32>
    %c0_8 = arith.constant 0 : index
    %c0_9 = arith.constant 0 : index
    %9 = vector.load %arg4[%c0_8, %c0_9] : memref<3x64xf32, #tpu.memory_space<vmem>>, vector<1x64xf32>
    %10 = vector.broadcast %9 : vector<1x64xf32> to vector<24x64xf32>
    %11 = arith.addf %8, %10 : vector<24x64xf32>
    %c1 = arith.constant 1 : index
    %c0_10 = arith.constant 0 : index
    %12 = vector.load %arg4[%c1, %c0_10] : memref<3x64xf32, #tpu.memory_space<vmem>>, vector<1x64xf32>
    %c2 = arith.constant 2 : index
    %c0_11 = arith.constant 0 : index
    %13 = vector.load %arg4[%c2, %c0_11] : memref<3x64xf32, #tpu.memory_space<vmem>>, vector<1x64xf32>
    %cst_12 = arith.constant dense<0.000000e+00> : vector<64xf32>
    %14 = vector.multi_reduction <add>, %11, %cst_12 [0] : vector<24x64xf32> to vector<64xf32>
    %15 = vector.shape_cast %14 : vector<64xf32> to vector<1x64xf32>
    %cst_13 = arith.constant 2.400000e+01 : f32
    %16 = vector.broadcast %cst_13 : f32 to vector<1x64xf32>
    %17 = arith.divf %15, %16 : vector<1x64xf32>
    %18 = vector.broadcast %17 : vector<1x64xf32> to vector<24x64xf32>
    %19 = arith.subf %11, %18 : vector<24x64xf32>
    %20 = vector.broadcast %17 : vector<1x64xf32> to vector<24x64xf32>
    %21 = arith.subf %11, %20 : vector<24x64xf32>
    %22 = arith.mulf %19, %21 : vector<24x64xf32>
    %cst_14 = arith.constant dense<0.000000e+00> : vector<64xf32>
    %23 = vector.multi_reduction <add>, %22, %cst_14 [0] : vector<24x64xf32> to vector<64xf32>
    %24 = vector.shape_cast %23 : vector<64xf32> to vector<1x64xf32>
    %cst_15 = arith.constant 2.400000e+01 : f32
    %25 = vector.broadcast %cst_15 : f32 to vector<1x64xf32>
    %26 = arith.divf %24, %25 : vector<1x64xf32>
    %27 = vector.broadcast %17 : vector<1x64xf32> to vector<24x64xf32>
    %28 = arith.subf %11, %27 : vector<24x64xf32>
    %cst_16 = arith.constant 9.99999974E-6 : f32
    %29 = vector.broadcast %cst_16 : f32 to vector<1x64xf32>
    %30 = arith.addf %26, %29 : vector<1x64xf32>
    %31 = math.rsqrt %30 : vector<1x64xf32>
    %32 = vector.broadcast %31 : vector<1x64xf32> to vector<24x64xf32>
    %33 = arith.mulf %28, %32 : vector<24x64xf32>
    %34 = vector.broadcast %12 : vector<1x64xf32> to vector<24x64xf32>
    %35 = arith.mulf %33, %34 : vector<24x64xf32>
    %36 = vector.broadcast %13 : vector<1x64xf32> to vector<24x64xf32>
    %37 = arith.addf %35, %36 : vector<24x64xf32>
    %cst_17 = arith.constant 0.000000e+00 : f32
    %38 = vector.broadcast %cst_17 : f32 to vector<24x64xf32>
    %39 = arith.maximumf %37, %38 : vector<24x64xf32>
    %c0_18 = arith.constant 0 : index
    %c0_19 = arith.constant 0 : index
    %40 = vector.load %arg7[%c0_18, %c0_19] : memref<64x256xf32, #tpu.memory_space<vmem>>, vector<64x256xf32>
    %cst_20 = arith.constant dense<0.000000e+00> : vector<24x256xf32>
    %41 = tpu.matmul %39, %40, %cst_20 {dimension_numbers = #tpu.dot_dimension_numbers<[1], [0], [0], [1], [0, 0, 1, 1], [], []>} : vector<24x64xf32>, vector<64x256xf32>, vector<24x256xf32> -> vector<24x256xf32>
    %c0_21 = arith.constant 0 : index
    %c0_22 = arith.constant 0 : index
    %42 = vector.load %arg5[%c0_21, %c0_22] : memref<24x1xf32, #tpu.memory_space<vmem>>, vector<24x1xf32>
    %43 = vector.extract_strided_slice %41 {offsets = [0, 0], sizes = [24, 128], strides = [1, 1]} : vector<24x256xf32> to vector<24x128xf32>
    %44 = vector.broadcast %42 : vector<24x1xf32> to vector<24x128xf32>
    %45 = arith.mulf %44, %43 : vector<24x128xf32>
    %46 = vector.extract_strided_slice %41 {offsets = [0, 128], sizes = [24, 128], strides = [1, 1]} : vector<24x256xf32> to vector<24x128xf32>
    %c0_23 = arith.constant 0 : index
    %c0_24 = arith.constant 0 : index
    %47 = vector.load %arg6[%c0_23, %c0_24] : memref<24x24xf32, #tpu.memory_space<vmem>>, vector<24x24xf32>
    %cst_25 = arith.constant dense<0.000000e+00> : vector<24x128xf32>
    %48 = tpu.matmul %47, %46, %cst_25 {dimension_numbers = #tpu.dot_dimension_numbers<[1], [0], [0], [1], [0, 0, 1, 1], [], []>} : vector<24x24xf32>, vector<24x128xf32>, vector<24x128xf32> -> vector<24x128xf32>
    %49 = arith.addf %45, %48 : vector<24x128xf32>
    %c0_26 = arith.constant 0 : index
    %c0_27 = arith.constant 0 : index
    %50 = vector.load %arg8[%c0_26, %c0_27] : memref<3x128xf32, #tpu.memory_space<vmem>>, vector<1x128xf32>
    %51 = vector.broadcast %50 : vector<1x128xf32> to vector<24x128xf32>
    %52 = arith.addf %49, %51 : vector<24x128xf32>
    %53 = arith.addf %0, %52 : vector<24x128xf32>
    %c1_28 = arith.constant 1 : index
    %c0_29 = arith.constant 0 : index
    %54 = vector.load %arg8[%c1_28, %c0_29] : memref<3x128xf32, #tpu.memory_space<vmem>>, vector<1x128xf32>
    %c2_30 = arith.constant 2 : index
    %c0_31 = arith.constant 0 : index
    %55 = vector.load %arg8[%c2_30, %c0_31] : memref<3x128xf32, #tpu.memory_space<vmem>>, vector<1x128xf32>
    %cst_32 = arith.constant dense<0.000000e+00> : vector<128xf32>
    %56 = vector.multi_reduction <add>, %53, %cst_32 [0] : vector<24x128xf32> to vector<128xf32>
    %57 = vector.shape_cast %56 : vector<128xf32> to vector<1x128xf32>
    %cst_33 = arith.constant 2.400000e+01 : f32
    %58 = vector.broadcast %cst_33 : f32 to vector<1x128xf32>
    %59 = arith.divf %57, %58 : vector<1x128xf32>
    %60 = vector.broadcast %59 : vector<1x128xf32> to vector<24x128xf32>
    %61 = arith.subf %53, %60 : vector<24x128xf32>
    %62 = vector.broadcast %59 : vector<1x128xf32> to vector<24x128xf32>
    %63 = arith.subf %53, %62 : vector<24x128xf32>
    %64 = arith.mulf %61, %63 : vector<24x128xf32>
    %cst_34 = arith.constant dense<0.000000e+00> : vector<128xf32>
    %65 = vector.multi_reduction <add>, %64, %cst_34 [0] : vector<24x128xf32> to vector<128xf32>
    %66 = vector.shape_cast %65 : vector<128xf32> to vector<1x128xf32>
    %cst_35 = arith.constant 2.400000e+01 : f32
    %67 = vector.broadcast %cst_35 : f32 to vector<1x128xf32>
    %68 = arith.divf %66, %67 : vector<1x128xf32>
    %69 = vector.broadcast %59 : vector<1x128xf32> to vector<24x128xf32>
    %70 = arith.subf %53, %69 : vector<24x128xf32>
    %cst_36 = arith.constant 9.99999974E-6 : f32
    %71 = vector.broadcast %cst_36 : f32 to vector<1x128xf32>
    %72 = arith.addf %68, %71 : vector<1x128xf32>
    %73 = math.rsqrt %72 : vector<1x128xf32>
    %74 = vector.broadcast %73 : vector<1x128xf32> to vector<24x128xf32>
    %75 = arith.mulf %70, %74 : vector<24x128xf32>
    %76 = vector.broadcast %54 : vector<1x128xf32> to vector<24x128xf32>
    %77 = arith.mulf %75, %76 : vector<24x128xf32>
    %78 = vector.broadcast %55 : vector<1x128xf32> to vector<24x128xf32>
    %79 = arith.addf %77, %78 : vector<24x128xf32>
    %cst_37 = arith.constant 0.000000e+00 : f32
    %80 = vector.broadcast %cst_37 : f32 to vector<24x128xf32>
    %81 = arith.maximumf %79, %80 : vector<24x128xf32>
    %c0_38 = arith.constant 0 : index
    %c0_39 = arith.constant 0 : index
    %82 = vector.load %arg13[%c0_38, %c0_39] : memref<2x24xf32, #tpu.memory_space<vmem>>, vector<2x24xf32>
    %cst_40 = arith.constant dense<0.000000e+00> : vector<2x128xf32>
    %83 = tpu.matmul %82, %81, %cst_40 {dimension_numbers = #tpu.dot_dimension_numbers<[1], [0], [0], [1], [0, 0, 1, 1], [], []>} : vector<2x24xf32>, vector<24x128xf32>, vector<2x128xf32> -> vector<2x128xf32>
    %c0_41 = arith.constant 0 : index
    %c0_42 = arith.constant 0 : index
    %84 = vector.load %arg9[%c0_41, %c0_42] : memref<128x32xf32, #tpu.memory_space<vmem>>, vector<128x32xf32>
    %cst_43 = arith.constant dense<0.000000e+00> : vector<2x32xf32>
    %85 = tpu.matmul %83, %84, %cst_43 {dimension_numbers = #tpu.dot_dimension_numbers<[1], [0], [0], [1], [0, 0, 1, 1], [], []>} : vector<2x128xf32>, vector<128x32xf32>, vector<2x32xf32> -> vector<2x32xf32>
    %c0_44 = arith.constant 0 : index
    %c0_45 = arith.constant 0 : index
    %86 = vector.load %arg10[%c0_44, %c0_45] : memref<1x32xf32, #tpu.memory_space<vmem>>, vector<1x32xf32>
    %87 = vector.broadcast %86 : vector<1x32xf32> to vector<2x32xf32>
    %88 = arith.addf %85, %87 : vector<2x32xf32>
    %cst_46 = arith.constant 0.000000e+00 : f32
    %89 = vector.broadcast %cst_46 : f32 to vector<2x32xf32>
    %90 = arith.maximumf %88, %89 : vector<2x32xf32>
    %c0_47 = arith.constant 0 : index
    %c0_48 = arith.constant 0 : index
    %91 = vector.load %arg11[%c0_47, %c0_48] : memref<32x12xf32, #tpu.memory_space<vmem>>, vector<32x12xf32>
    %cst_49 = arith.constant dense<0.000000e+00> : vector<2x12xf32>
    %92 = tpu.matmul %90, %91, %cst_49 {dimension_numbers = #tpu.dot_dimension_numbers<[1], [0], [0], [1], [0, 0, 1, 1], [], []>} : vector<2x32xf32>, vector<32x12xf32>, vector<2x12xf32> -> vector<2x12xf32>
    %c0_50 = arith.constant 0 : index
    %c0_51 = arith.constant 0 : index
    %93 = vector.load %arg12[%c0_50, %c0_51] : memref<1x12xf32, #tpu.memory_space<vmem>>, vector<1x12xf32>
    %94 = vector.broadcast %93 : vector<1x12xf32> to vector<2x12xf32>
    %95 = arith.addf %92, %94 : vector<2x12xf32>
    %cst_52 = arith.constant 0.000000e+00 : f32
    %96 = vector.broadcast %cst_52 : f32 to vector<2x12xf32>
    %97 = arith.subf %96, %95 : vector<2x12xf32>
    %98 = math.exp %97 : vector<2x12xf32>
    %cst_53 = arith.constant 1.000000e+00 : f32
    %99 = vector.broadcast %cst_53 : f32 to vector<2x12xf32>
    %100 = arith.addf %99, %98 : vector<2x12xf32>
    %cst_54 = arith.constant 1.000000e+00 : f32
    %101 = vector.broadcast %cst_54 : f32 to vector<2x12xf32>
    %102 = arith.divf %101, %100 : vector<2x12xf32>
    %c0_55 = arith.constant 0 : index
    %c0_56 = arith.constant 0 : index
    %103 = vector.load %arg14[%c0_55, %c0_56] : memref<24x2xf32, #tpu.memory_space<vmem>>, vector<24x2xf32>
    %cst_57 = arith.constant dense<0.000000e+00> : vector<24x12xf32>
    %104 = tpu.matmul %103, %102, %cst_57 {dimension_numbers = #tpu.dot_dimension_numbers<[1], [0], [0], [1], [0, 0, 1, 1], [], []>} : vector<24x2xf32>, vector<2x12xf32>, vector<24x12xf32> -> vector<24x12xf32>
    %c0_58 = arith.constant 0 : index
    %c0_59 = arith.constant 0 : index
    %105 = vector.load %arg15[%c0_58, %c0_59] : memref<24x12xf32, #tpu.memory_space<vmem>>, vector<24x12xf32>
    %106 = arith.mulf %104, %105 : vector<24x12xf32>
    %cst_60 = arith.constant dense<0.000000e+00> : vector<24xf32>
    %107 = vector.multi_reduction <add>, %106, %cst_60 [1] : vector<24x12xf32> to vector<24xf32>
    %108 = vector.shape_cast %107 : vector<24xf32> to vector<24x1xf32>
    %cst_61 = arith.constant 1.000000e+00 : f32
    %109 = vector.broadcast %cst_61 : f32 to vector<24x1xf32>
    %110 = arith.addf %109, %108 : vector<24x1xf32>
    %111 = vector.broadcast %110 : vector<24x1xf32> to vector<24x128xf32>
    %112 = arith.mulf %81, %111 : vector<24x128xf32>
    %c0_62 = arith.constant 0 : index
    %c0_63 = arith.constant 0 : index
    %113 = vector.load %arg16[%c0_62, %c0_63] : memref<24x128xf32, #tpu.memory_space<vmem>>, vector<24x128xf32>
    tpu.vector_store %arg16[%c0_62, %c0_63], %112 {strides = array<i32>} : memref<24x128xf32, #tpu.memory_space<vmem>>, vector<24x128xf32>,
    return
  }
}

</mosaic_0001>

<bundles_post_ra>
// kernel: res_graph_conv_attention_forward.1
= control target key start
LH: loop header
LB: loop body
LE: loop exit
PB: predicated region body
PF: predicated region fallthrough
CT: control target
= control target key end

     0   :  { %v694_v2 = vmov 0   ;;  %vm80_vm0 = vcmask 195584   ;;  %v695_v56 = vmov 24.0   ;;  %vm204_vm1 = vcmask 523264   ;;  %s1160_s0 = inlined_call_operand.vmem [shape: f32[24,128], index: 0, kind: input, shape index: {}]   ;;  %s1161_s1 = inlined_call_operand.vmem [shape: f32[24,1], index: 1, kind: input, shape index: {}]   ;;  %s1162_s2 = inlined_call_operand.vmem [shape: f32[24,24], index: 2, kind: input, shape index: {}]   ;;  %s1163_s3 = inlined_call_operand.vmem [shape: f32[256,64], index: 3, kind: input, shape index: {}]   ;;  %s1164_s5 = inlined_call_operand.vmem [shape: f32[24,1], index: 5, kind: input, shape index: {}]   ;;  %s1165_s4 = inlined_call_operand.vmem [shape: f32[3,64], index: 4, kind: input, shape index: {}]   ;;  %s1166_s7 = inlined_call_operand.vmem [shape: f32[64,256], index: 7, kind: input, shape index: {}]   ;;  %s1167_s8 = inlined_call_operand.vmem [shape: f32[3,128], index: 8, kind: input, shape index: {}]   ;;  %s1168_s6 = inlined_call_operand.vmem [shape: f32[24,24], index: 6, kind: input, shape index: {}]   ;;  %s1169_s9 = inlined_call_operand.vmem [shape: f32[128,32], index: 9, kind: input, shape index: {}]   ;;  %s1170_s13 = inlined_call_operand.vmem [shape: f32[2,24], index: 13, kind: input, shape index: {}]   ;;  %s1171_s10 = inlined_call_operand.vmem [shape: f32[1,32], index: 10, kind: input, shape index: {}]   ;;  %s1172_s11 = inlined_call_operand.vmem [shape: f32[32,12], index: 11, kind: input, shape index: {}]   ;;  %s1173_s12 = inlined_call_operand.vmem [shape: f32[1,12], index: 12, kind: input, shape index: {}]   ;;  %s1174_s14 = inlined_call_operand.vmem [shape: f32[24,2], index: 14, kind: input, shape index: {}]   ;;  %s1175_s15 = inlined_call_operand.vmem [shape: f32[24,12], index: 15, kind: input, shape index: {}]   ;;  %s1176_s16 = inlined_call_operand.vmem [shape: f32[24,128], index: 16, kind: output, shape index: {}]  }
   0x1   :  { %1178 = sst [smem:[#allocation2_spill]] %s1160_s0  ;;  %673 = vset.pattern.permute.xlu0 %v694_v2  ;;  %674 = vset.pattern.permute.xlu1 %v694_v2  ;;  %v56_v3 = vld [vmem:[%s1161_s1] sm:$0xff]  ;;  %v58_v5 = vld [vmem:[%s1161_s1 + $0x10] sm:$0xff]  ;;  %v131_v7 = vld [vmem:[%s1163_s3 + $0x78] sm:$0xff]  ;;  %684 = vrcp.f32 %v695_v56  ;;  %vm538_vm9 = vcmask 261120   ;;  %vm594_vm13 = vcmask 1041408  }
   0x2   :  { %s1179_s23 = sld [smem:[#allocation2_spill]]  ;;  %675 = vset.pattern.permute.xlu2 %v694_v2  ;;  %61 = vperm.xlu0 %673, %v56_v3   ;;  %v77_v6 = vld [vmem:[%s1162_s2] sm:$0xff]  ;;  %v130_v8 = vld [vmem:[%s1163_s3 + $0x70] sm:$0xff]  ;;  %v147_v9 = vld [vmem:[%s1163_s3 + $0xf8] sm:$0xff]  ;;  %vm584_vm15 = vcmask 15360  }
   0x3   :  { %71 = vperm.xlu1 %674, %v58_v5   ;;  %150 = vmatpush.msra.mxu1 %v131_v7  ;;  %v129_v10 = vld [vmem:[%s1163_s3 + $0x68] sm:$0xff]  ;;  %v146_v11 = vld [vmem:[%s1163_s3 + $0xf0] sm:$0xff]  ;;  %v128_v13 = vld [vmem:[%s1163_s3 + $0x60] sm:$0xff] }
   0x4   :  { %v57_v12 = vld [vmem:[%s1161_s1 + $0x8] sm:$0xff]  ;;  %v344_v14 = vld [vmem:[%s1164_s5] sm:$0xff]  ;;  %v127_v16 = vld [vmem:[%s1163_s3 + $0x58] sm:$0xff] }
   0x5   :  { %151 = vmatpush.msra.mxu1 %v130_v8  ;;  %v145_v15 = vld [vmem:[%s1163_s3 + $0xe8] sm:$0xff]  ;;  %v144_v17 = vld [vmem:[%s1163_s3 + $0xe0] sm:$0xff]  ;;  %v126_v19 = vld [vmem:[%s1163_s3 + $0x50] sm:$0xff] }
   0x6   :  { %v78_v18 = vld [vmem:[%s1162_s2 + $0x8] sm:$0xff]  ;;  %v143_v20 = vld [vmem:[%s1163_s3 + $0xd8] sm:$0xff]  ;;  %v142_v22 = vld [vmem:[%s1163_s3 + $0xd0] sm:$0xff] }
   0x7   :  { %152 = vmatpush.msra.mxu1 %v129_v10  ;;  %v125_v21 = vld [vmem:[%s1163_s3 + $0x48] sm:$0xff]  ;;  %v124_v23 = vld [vmem:[%s1163_s3 + $0x40] sm:$0xff]  ;;  %v123_v25 = vld [vmem:[%s1163_s3 + $0x38] sm:$0xff]  ;;  %v685_v62 = vpop.eup %684 }
   0x8   :  { %v784_v0 = vld [vmem:[%s1179_s23 + $0x10] sm:$0xff]  ;;  %v789_v1 = vld [vmem:[%s1179_s23 + $0x8] sm:$0xff]  ;;  %v798_v4 = vld [vmem:[%s1179_s23] sm:$0xff]  ;;  %v217_v5 = vmul.f32 24.0, %v685_v62  ;;  %vm221_vm2 = vweird.f32 %v685_v62 }
   0x9   :  { %103 = vmatpush.msra.mxu2 %v784_v0  ;;  %153 = vmatpush.msra.mxu1 %v128_v13  ;;  %v141_v24 = vld [vmem:[%s1163_s3 + $0xc8] sm:$0xff]  ;;  %v140_v26 = vld [vmem:[%s1163_s3 + $0xc0] sm:$0xff]  ;;  %v79_v27 = vld [vmem:[%s1162_s2 + $0x10] sm:$0xff] }
   0xa   :  { %66 = vperm.xlu0 %673, %v57_v12   ;;  %v122_v28 = vld [vmem:[%s1163_s3 + $0x30] sm:$0xff]  ;;  %v139_v29 = vld [vmem:[%s1163_s3 + $0xb8] sm:$0xff]  ;;  %v121_v30 = vld [vmem:[%s1163_s3 + $0x28] sm:$0xff] }
   0xb   :  { %104 = vmatpush.msra.mxu2 %v789_v1  ;;  %349 = vperm.xlu1 %674, %v344_v14   ;;  %v138_v31 = vld [vmem:[%s1163_s3 + $0xb0] sm:$0xff]  ;;  %v120_v32 = vld [vmem:[%s1163_s3 + $0x20] sm:$0xff]  ;;  %v137_v33 = vld [vmem:[%s1163_s3 + $0xa8] sm:$0xff] }
   0xc   :  { %154 = vmatpush.msra.mxu1 %v127_v16  ;;  %v119_v34 = vld [vmem:[%s1163_s3 + $0x18] sm:$0xff]  ;;  %v118_v35 = vld [vmem:[%s1163_s3 + $0x10] sm:$0xff]  ;;  %v136_v36 = vld [vmem:[%s1163_s3 + $0xa0] sm:$0xff] }
   0xd   :  { %105 = vmatpush.msra.mxu2 %v798_v4  ;;  %v117_v37 = vld [vmem:[%s1163_s3 + $0x8] sm:$0xff]  ;;  %v135_v38 = vld [vmem:[%s1163_s3 + $0x98] sm:$0xff]  ;;  %v116_v39 = vld [vmem:[%s1163_s3] sm:$0xff] }
   0xe   :  { %653 = vmatmul.msk.f32.vlgmr.msra.gmra.mxu2 %vm80_vm0, %v77_v6  ;;  %155 = vmatpush.msra.mxu1 %v126_v19  ;;  %v134_v40 = vld [vmem:[%s1163_s3 + $0x90] sm:$0xff]  ;;  %v133_v41 = vld [vmem:[%s1163_s3 + $0x88] sm:$0xff]  ;;  %v132_v42 = vld [vmem:[%s1163_s3 + $0x80] sm:$0xff] }
   0xf   :  { %176 = vmatpush.msrb.mxu2 %v147_v9  ;;  %v676_v55 = vld [vmem:[%s1165_s4] ss:$0 sm:$0xff] }
  0x10   :  { %156 = vmatpush.msra.mxu1 %v125_v21 }
  0x11   :  { %177 = vmatpush.msrb.mxu2 %v146_v11  ;;  %v218_v11 = vsub.f32 1.0, %v217_v5  ;;  %v346_v5 = vld [vmem:[%s1164_s5 + $0x10] sm:$0xff] }
  0x12   :  { %157 = vmatpush.msra.mxu1 %v124_v23 }
  0x13   :  { %178 = vmatpush.msrb.mxu2 %v145_v15  ;;  %v219_v14 = vmul.f32 %v685_v62, %v218_v11 }
  0x14   :  { %158 = vmatpush.msra.mxu1 %v123_v25 }
  0x15   :  { %179 = vmatpush.msrb.mxu2 %v144_v17  ;;  %v220_v17 = vadd.f32 %v685_v62, %v219_v14 }
  0x16   :  { %654 = vmatmul.msk.f32.gmra.mxu2 %vm80_vm0, %v78_v18  ;;  %159 = vmatpush.msra.mxu1 %v122_v28 }
  0x17   :  { %180 = vmatpush.msrb.mxu2 %v143_v20  ;;  %v928_v20 = vsel %vm221_vm2, %v685_v62, %v220_v17 }
  0x18   :  { %160 = vmatpush.msra.mxu1 %v121_v30  ;;  %v282_v30 = vld [vmem:[%s1166_s7 + $0x78] sm:$0xff] }
  0x19   :  { %181 = vmatpush.msrb.mxu2 %v142_v22  ;;  %326 = vmatpush.msra.mxu0 %v282_v30 }
  0x1a   :  { %161 = vmatpush.msra.mxu1 %v120_v32 }
  0x1b   :  { %182 = vmatpush.msrb.mxu2 %v141_v24 }
  0x1c   :  { %162 = vmatpush.msra.mxu1 %v119_v34  ;;  %v279_v34 = vld [vmem:[%s1166_s7 + $0x60] sm:$0xff] }
  0x1d   :  { %183 = vmatpush.msrb.mxu2 %v140_v26 }
  0x1e   :  { %655 = vmatmul.msk.f32.gmra.mxu2 %vm80_vm0, %v79_v27  ;;  %163 = vmatpush.msra.mxu1 %v118_v35  ;;  %v280_v35 = vld [vmem:[%s1166_s7 + $0x68] sm:$0xff] }
  0x1f   :  { %184 = vmatpush.msrb.mxu2 %v139_v29  ;;  %v281_v29 = vld [vmem:[%s1166_s7 + $0x70] sm:$0xff]  ;;  %327 = vmatpush.msra.mxu0 %v280_v35 }
  0x20   :  { %164 = vmatpush.msra.mxu1 %v117_v37  ;;  %300 = vmatpush.msra.mxu3 %v281_v29 }
  0x21   :  { %185 = vmatpush.msrb.mxu2 %v138_v31 }
  0x22   :  { %165 = vmatpush.msra.mxu1 %v116_v39  ;;  %301 = vmatpush.msra.mxu3 %v279_v34  ;;  %v278_v39 = vld [vmem:[%s1166_s7 + $0x58] sm:$0xff] }
  0x23   :  { %186 = vmatpush.msrb.mxu2 %v137_v33  ;;  %328 = vmatpush.msra.mxu0 %v278_v39 }
  0x25   :  { %187 = vmatpush.msrb.mxu2 %v136_v36 }
  0x27   :  { %188 = vmatpush.msrb.mxu2 %v135_v38  ;;  %v277_v38 = vld [vmem:[%s1166_s7 + $0x50] sm:$0xff] }
  0x28   :  { %302 = vmatpush.msra.mxu3 %v277_v38  ;;  %v679_v38 = vld [vmem:[%s1167_s8] ss:$0 sm:$0xff] }
  0x29   :  { %189 = vmatpush.msrb.mxu2 %v134_v40 }
  0x2b   :  { %190 = vmatpush.msrb.mxu2 %v133_v41  ;;  %v275_v41 = vld [vmem:[%s1166_s7 + $0x40] sm:$0xff] }
  0x2c   :  { %303 = vmatpush.msra.mxu3 %v275_v41 }
  0x2d   :  { %191 = vmatpush.msrb.mxu2 %v132_v42  ;;  %v276_v42 = vld [vmem:[%s1166_s7 + $0x48] sm:$0xff] }
  0x2e   :  { %329 = vmatpush.msra.mxu0 %v276_v42 }
  0x74   :  { %v62_v43 = vpop.permute.xlu0 %61 }
  0x75   :  { %v74_v44 = vmul.f32 %v62_v43, %v798_v4  ;;  %v72_v47 = vpop.permute.xlu1 %71 }
  0x76   :  { %v76_v48 = vmul.f32 %v72_v47, %v784_v0  ;;  %v272_v47 = vld [vmem:[%s1166_s7 + $0x28] sm:$0xff] }
  0x77   :  { %166 = vmatmul.f32.vlgmr.msra.gmra.mxu1 %v74_v44  ;;  %v273_v44 = vld [vmem:[%s1166_s7 + $0x30] sm:$0xff] }
  0x78   :  { %304 = vmatpush.msra.mxu3 %v273_v44 }
  0x7c   :  { %v67_v45 = vpop.permute.xlu0 %66 }
  0x7d   :  { %v75_v46 = vmul.f32 %v67_v45, %v789_v1  ;;  %v274_v45 = vld [vmem:[%s1166_s7 + $0x38] sm:$0xff] }
  0x7e   :  { %330 = vmatpush.msra.mxu0 %v274_v45 }
  0x7f   :  { %169 = vmatmul.f32.gmra.mxu1 %v75_v46  ;;  %v271_v46 = vld [vmem:[%s1166_s7 + $0x20] sm:$0xff] }
  0x80   :  { %305 = vmatpush.msra.mxu3 %v271_v46  ;;  %331 = vmatpush.msra.mxu0 %v272_v47 }
  0x87   :  { %172 = vmatmul.f32.gmra.mxu1 %v76_v48 }
  0x91   :  { %v107_v49 = vpop.f32.mrf.mxu2 }
  0x92   :  { %192 = vmatmul.f32.vlgmr.msrb.gmra.mxu2 %v107_v49  ;;  %v269_v49 = vld [vmem:[%s1166_s7 + $0x10] sm:$0xff] }
  0x93   :  { %306 = vmatpush.msra.mxu3 %v269_v49 }
  0x99   :  { %v110_v50 = vpop.f32.mrf.mxu2 }
  0x9a   :  { %195 = vmatmul.f32.gmra.mxu2 %v110_v50  ;;  %v270_v50 = vld [vmem:[%s1166_s7 + $0x18] sm:$0xff] }
  0x9b   :  { %332 = vmatpush.msra.mxu0 %v270_v50 }
  0xa1   :  { %v113_v51 = vpop.f32.mrf.mxu2 }
  0xa2   :  { %198 = vmatmul.f32.gmra.mxu2 %v113_v51 }
  0xf4   :  { %v167_v52 = vpop.f32.mrf.mxu1 }
  0xf5   :  { %v168_v58 = vadd.f32 %v676_v55, %v167_v52  ;;  %v267_v52 = vld [vmem:[%s1166_s7] sm:$0xff] }
  0xf6   :  { %307 = vmatpush.msra.mxu3 %v267_v52 }
  0xfc   :  { %v170_v54 = vpop.f32.mrf.mxu1 }
  0xfd   :  { %v171_v59 = vadd.f32 %v676_v55, %v170_v54 }
 0x104   :  { %v173_v60 = vpop.f32.mrf.mxu1 }
 0x105   :  { %v174_v2 = vadd.f32 %v676_v55, %v173_v60 }
 0x115   :  { %v193_v53 = vpop.f32.mrf.mxu2 }
 0x116   :  { %v194_v63 = vadd.f32 %v193_v53, %v168_v58  ;;  %v268_v53 = vld [vmem:[%s1166_s7 + $0x8] sm:$0xff] }
 0x117   :  { %333 = vmatpush.msra.mxu0 %v268_v53 }
 0x118   :  { %v205_v7 = vsel %vm204_vm1, %v194_v63, 0.0 }
 0x11d   :  { %v196_v57 = vpop.f32.mrf.mxu2 }
 0x11e   :  { %v197_v61 = vadd.f32 %v196_v57, %v171_v59 }
 0x120   :  { %v206_v3 = vsel %vm204_vm1, %v197_v61, 0.0 }
 0x121   :  { %v207_v9 = vadd.f32 %v206_v3, %v205_v7  ;;  %v677_v3 = vld [vmem:[%s1165_s4 + $0x1] ss:$0 sm:$0xff] }
 0x125   :  { %v199_v6 = vpop.f32.mrf.mxu2 }
 0x126   :  { %v200_v8 = vadd.f32 %v199_v6, %v174_v2 }
 0x128   :  { %v208_v10 = vsel %vm204_vm1, %v200_v8, 0.0 }
 0x129   :  { %v209_v12 = vadd.f32 %v208_v10, %v207_v9 }
 0x12b   :  { %v210_v13 = vrot.slane %v209_v12, 4 }
 0x12d   :  { %v211_v15 = vadd.f32 %v210_v13, %v209_v12 }
 0x12f   :  { %v212_v16 = vrot.slane %v211_v15, 2 }
 0x131   :  { %v213_v18 = vadd.f32 %v212_v16, %v211_v15 }
 0x133   :  { %v214_v19 = vrot.slane %v213_v18, 1 }
 0x135   :  { %v215_v21 = vadd.f32 %v214_v19, %v213_v18 }
 0x137   :  { %v223_v22 = vmul.f32 %v928_v20, %v215_v21 }
 0x139   :  { %v931_v23 = vsub.f32 %v194_v63, %v223_v22  ;;  %v933_v24 = vsub.f32 %v197_v61, %v223_v22  ;;  %v935_v25 = vsub.f32 %v200_v8, %v223_v22  ;;  %v345_v61 = vld [vmem:[%s1164_s5 + $0x8] sm:$0xff]  ;;  %v678_v8 = vld [vmem:[%s1165_s4 + $0x2] ss:$0 sm:$0xff] }
 0x13a   :  { %354 = vperm.xlu2 %675, %v345_v61  }
 0x13b   :  { %v227_v26 = vmul.f32 %v931_v23, %v931_v23  ;;  %v228_v27 = vmul.f32 %v933_v24, %v933_v24  ;;  %v229_v28 = vmul.f32 %v935_v25, %v935_v25 }
 0x13d   :  { %v230_v31 = vsel %vm204_vm1, %v227_v26, 0.0  ;;  %v231_v32 = vsel %vm204_vm1, %v228_v27, 0.0  ;;  %v233_v36 = vsel %vm204_vm1, %v229_v28, 0.0  ;;  %v367_v26 = vld [vmem:[%s1168_s6 + $0x10] sm:$0xff] }
 0x13e   :  { %v232_v33 = vadd.f32 %v231_v32, %v230_v31 }
 0x140   :  { %v234_v37 = vadd.f32 %v233_v36, %v232_v33  ;;  %v350_v33 = vpop.permute.xlu1 %349 }
 0x142   :  { %v235_v40 = vrot.slane %v234_v37, 4  ;;  %359 = vperm.xlu2 %675, %v346_v5  }
 0x144   :  { %v236_v43 = vadd.f32 %v235_v40, %v234_v37 }
 0x146   :  { %v237_v48 = vrot.slane %v236_v43, 2 }
 0x148   :  { %v238_v51 = vadd.f32 %v237_v48, %v236_v43 }
 0x14a   :  { %v239_v54 = vrot.slane %v238_v51, 1 }
 0x14c   :  { %v240_v55 = vadd.f32 %v239_v54, %v238_v51 }
 0x14e   :  { %v241_v56 = vmul.f32 %v240_v55, %v928_v20 }
 0x150   :  { %v242_v57 = vadd.f32 1e-05, %v241_v56 }
 0x152   :  { %686 = vrsqrt.f32 %v242_v57  ;;  %vm249_vm4 = vweird.f32 %v242_v57 }
 0x158   :  { %v687_v58 = vpop.eup %686 }
 0x159   :  { %v244_v59 = vmul.f32 %v687_v58, %v242_v57  ;;  %vm250_vm3 = vweird.f32 %v687_v58 }
 0x15a   :  { %vm251_vm5 = vmor %vm249_vm4, %vm250_vm3 }
 0x15b   :  { %v245_v60 = vmul.f32 %v687_v58, %v244_v59 }
 0x15d   :  { %v246_v62 = vmul.f32 0.5, %v245_v60 }
 0x15f   :  { %v247_v63 = vsub.f32 1.5, %v246_v62 }
 0x161   :  { %v248_v2 = vmul.f32 %v687_v58, %v247_v63 }
 0x163   :  { %v252_v6 = vsel %vm251_vm5, %v687_v58, %v248_v2 }
 0x164   :  { %v253_v7 = vmul.f32 %v252_v6, %v931_v23  ;;  %v254_v10 = vmul.f32 %v252_v6, %v933_v24  ;;  %v255_v14 = vmul.f32 %v252_v6, %v935_v25  ;;  %v365_v24 = vld [vmem:[%s1168_s6] sm:$0xff]  ;;  %v366_v25 = vld [vmem:[%s1168_s6 + $0x8] sm:$0xff] }
 0x166   :  { %v257_v9 = vmul.f32 %v677_v3, %v253_v7  ;;  %v258_v13 = vmul.f32 %v677_v3, %v254_v10  ;;  %v259_v17 = vmul.f32 %v677_v3, %v255_v14  ;;  %v504_v10 = vld [vmem:[%s1169_s9 + $0x78] sm:$0xff] }
 0x167   :  { %509 = vmatpush.msrb.mxu1 %v504_v10 }
 0x168   :  { %v261_v11 = vadd.f32 %v678_v8, %v257_v9  ;;  %v262_v15 = vadd.f32 %v678_v8, %v258_v13  ;;  %v263_v18 = vadd.f32 %v678_v8, %v259_v17  ;;  %v500_v13 = vld [vmem:[%s1169_s9 + $0x58] sm:$0xff] }
 0x16a   :  { %v264_v12 = vmax.f32 %v261_v11, 0.0  ;;  %v265_v16 = vmax.f32 %v262_v15, 0.0  ;;  %v266_v19 = vmax.f32 %v263_v18, 0.0  ;;  %v503_v11 = vld [vmem:[%s1169_s9 + $0x70] sm:$0xff]  ;;  %v498_v18 = vld [vmem:[%s1169_s9 + $0x48] sm:$0xff] }
 0x16b   :  { %510 = vmatpush.msrb.mxu1 %v503_v11  ;;  %v582_v11 = vld [vmem:[%s1174_s14 + $0x8] sm:$0xff] }
 0x16c   :  { %656 = vmatmul.msk.f32.vlgmr.msra.gmra.mxu3 %vm204_vm1, %v264_v12  ;;  %659 = vmatmul.msk.f32.vlgmr.msra.gmra.mxu0 %vm204_vm1, %v264_v12  ;;  %v502_v12 = vld [vmem:[%s1169_s9 + $0x68] sm:$0xff] }
 0x16d   :  { %511 = vmatpush.msrb.mxu1 %v502_v12  ;;  %v583_v12 = vld [vmem:[%s1174_s14 + $0x10] sm:$0xff] }
 0x174   :  { %657 = vmatmul.msk.f32.gmra.mxu3 %vm204_vm1, %v265_v16  ;;  %660 = vmatmul.msk.f32.gmra.mxu0 %vm204_vm1, %v265_v16  ;;  %v499_v16 = vld [vmem:[%s1169_s9 + $0x50] sm:$0xff] }
 0x17c   :  { %658 = vmatmul.msk.f32.gmra.mxu3 %vm204_vm1, %v266_v19  ;;  %661 = vmatmul.msk.f32.gmra.mxu0 %vm204_vm1, %v266_v19 }
 0x194   :  { %v355_v31 = vpop.permute.xlu2 %354 }
 0x19c   :  { %v360_v39 = vpop.permute.xlu2 %359 }
 0x1e9   :  { %v335_v21 = vpop.f32.mrf.mxu0 }
 0x1ef   :  { %v309_v27 = vpop.f32.mrf.mxu3 }
 0x1f0   :  { %v362_v35 = vmul.f32 %v350_v33, %v309_v27  ;;  %v493_v33 = vld [vmem:[%s1169_s9 + $0x20] sm:$0xff] }
 0x1f1   :  { %v338_v22 = vpop.f32.mrf.mxu0 }
 0x1f7   :  { %v312_v28 = vpop.f32.mrf.mxu3 }
 0x1f8   :  { %v363_v32 = vmul.f32 %v355_v31, %v312_v28  ;;  %v494_v28 = vld [vmem:[%s1169_s9 + $0x28] sm:$0xff] }
 0x1f9   :  { %v341_v23 = vpop.f32.mrf.mxu0 }
 0x1fa   :  { %390 = vmatpush.msrb.mxu3 %v341_v23  ;;  %v496_v23 = vld [vmem:[%s1169_s9 + $0x38] sm:$0xff] }
 0x1fc   :  { %391 = vmatpush.msrb.mxu3 %v338_v22 }
 0x1fe   :  { %392 = vmatpush.msrb.mxu3 %v335_v21  ;;  %v497_v21 = vld [vmem:[%s1169_s9 + $0x40] sm:$0xff] }
 0x1ff   :  { %662 = vmatmul.msk.f32.vlgmr.msrb.gmra.mxu3 %vm80_vm0, %v365_v24  ;;  %v315_v29 = vpop.f32.mrf.mxu3 }
 0x200   :  { %v364_v41 = vmul.f32 %v360_v39, %v315_v29 }
 0x207   :  { %663 = vmatmul.msk.f32.gmra.mxu3 %vm80_vm0, %v366_v25  ;;  %v495_v25 = vld [vmem:[%s1169_s9 + $0x30] sm:$0xff] }
 0x20f   :  { %664 = vmatmul.msk.f32.gmra.mxu3 %vm80_vm0, %v367_v26  ;;  %v680_v26 = vld [vmem:[%s1167_s8 + $0x1] ss:$0 sm:$0xff] }
 0x282   :  { %v394_v30 = vpop.f32.mrf.mxu3 }
 0x283   :  { %v403_v37 = vadd.f32 %v394_v30, %v362_v35  ;;  %v681_v30 = vld [vmem:[%s1167_s8 + $0x2] ss:$0 sm:$0xff] }
 0x285   :  { %v408_v42 = vadd.f32 %v679_v38, %v403_v37  ;;  %v492_v37 = vld [vmem:[%s1169_s9 + $0x18] sm:$0xff] }
 0x287   :  { %v411_v46 = vadd.f32 %v408_v42, %v798_v4 }
 0x28a   :  { %v397_v34 = vpop.f32.mrf.mxu3 }
 0x28b   :  { %v404_v36 = vadd.f32 %v397_v34, %v363_v32 }
 0x28d   :  { %v409_v40 = vadd.f32 %v679_v38, %v404_v36 }
 0x28f   :  { %v412_v44 = vadd.f32 %v409_v40, %v789_v1  ;;  %v491_v40 = vld [vmem:[%s1169_s9 + $0x10] sm:$0xff] }
 0x291   :  { %v416_v48 = vadd.f32 %v412_v44, %v411_v46 }
 0x292   :  { %v400_v43 = vpop.f32.mrf.mxu3 }
 0x293   :  { %v405_v45 = vadd.f32 %v400_v43, %v364_v41  ;;  %v490_v43 = vld [vmem:[%s1169_s9 + $0x8] sm:$0xff] }
 0x295   :  { %v410_v47 = vadd.f32 %v679_v38, %v405_v45 }
 0x297   :  { %v413_v49 = vadd.f32 %v410_v47, %v784_v0  ;;  %v489_v47 = vld [vmem:[%s1169_s9] sm:$0xff] }
 0x299   :  { %v417_v50 = vadd.f32 %v416_v48, %v413_v49  ;;  %v533_v48 = vld [vmem:[%s1172_s11 + $0x18] sm:$0xff] }
 0x29a   :  { %554 = vmatpush.msra.mxu2 %v533_v48 }
 0x29b   :  { %v418_v51 = vrot.slane %v417_v50, 4 }
 0x29d   :  { %v419_v52 = vadd.f32 %v418_v51, %v417_v50  ;;  %v532_v50 = vld [vmem:[%s1172_s11 + $0x10] sm:$0xff]  ;;  %v531_v51 = vld [vmem:[%s1172_s11 + $0x8] sm:$0xff] }
 0x29e   :  { %555 = vmatpush.msra.mxu2 %v532_v50 }
 0x29f   :  { %v420_v53 = vrot.slane %v419_v52, 2 }
 0x2a0   :  { %556 = vmatpush.msra.mxu2 %v531_v51 }
 0x2a1   :  { %v421_v54 = vadd.f32 %v420_v53, %v419_v52  ;;  %v530_v52 = vld [vmem:[%s1172_s11] sm:$0xff] }
 0x2a2   :  { %557 = vmatpush.msra.mxu2 %v530_v52  ;;  %v682_v53 = vld [vmem:[%s1171_s10] ss:$0 sm:$0xff] }
 0x2a3   :  { %v422_v55 = vrot.slane %v421_v54, 1 }
 0x2a5   :  { %v423_v56 = vadd.f32 %v422_v55, %v421_v54 }
 0x2a7   :  { %v424_v57 = vmul.f32 %v423_v56, %v928_v20 }
 0x2a9   :  { %v425_v58 = vsub.f32 %v411_v46, %v424_v57  ;;  %v426_v59 = vsub.f32 %v412_v44, %v424_v57  ;;  %v427_v60 = vsub.f32 %v413_v49, %v424_v57  ;;  %v465_v46 = vld [vmem:[%s1170_s13] sm:$0x3] }
 0x2aa   :  { %v683_v57 = vld [vmem:[%s1173_s12] ss:$0 sm:$0xff] }
 0x2ab   :  { %v428_v1 = vmul.f32 %v425_v58, %v425_v58  ;;  %v429_v61 = vmul.f32 %v426_v59, %v426_v59  ;;  %v430_v62 = vmul.f32 %v427_v60, %v427_v60 }
 0x2ad   :  { %v431_v4 = vadd.f32 %v429_v61, %v428_v1 }
 0x2af   :  { %v432_v63 = vadd.f32 %v431_v4, %v430_v62 }
 0x2b1   :  { %v433_v2 = vrot.slane %v432_v63, 4 }
 0x2b3   :  { %v434_v3 = vadd.f32 %v433_v2, %v432_v63 }
 0x2b5   :  { %v435_v0 = vrot.slane %v434_v3, 2 }
 0x2b7   :  { %v436_v5 = vadd.f32 %v435_v0, %v434_v3 }
 0x2b9   :  { %v437_v6 = vrot.slane %v436_v5, 1 }
 0x2bb   :  { %v438_v7 = vadd.f32 %v437_v6, %v436_v5 }
 0x2bd   :  { %v439_v8 = vmul.f32 %v438_v7, %v928_v20  ;;  %v501_v20 = vld [vmem:[%s1169_s9 + $0x60] sm:$0xff] }
 0x2be   :  { %512 = vmatpush.msrb.mxu1 %v501_v20  ;;  %v624_v20 = vld [vmem:[%s1175_s15] sm:$0xff] }
 0x2bf   :  { %v440_v9 = vadd.f32 1e-05, %v439_v8 }
 0x2c0   :  { %513 = vmatpush.msrb.mxu1 %v500_v13 }
 0x2c1   :  { %688 = vrsqrt.f32 %v440_v9  ;;  %vm447_vm7 = vweird.f32 %v440_v9 }
 0x2c2   :  { %514 = vmatpush.msrb.mxu1 %v499_v16  ;;  %v625_v16 = vld [vmem:[%s1175_s15 + $0x8] sm:$0xff] }
 0x2c4   :  { %515 = vmatpush.msrb.mxu1 %v498_v18 }
 0x2c6   :  { %516 = vmatpush.msrb.mxu1 %v497_v21  ;;  %v626_v21 = vld [vmem:[%s1175_s15 + $0x10] sm:$0xff] }
 0x2c7   :  { %v689_v14 = vpop.eup %688 }
 0x2c8   :  { %v442_v15 = vmul.f32 %v689_v14, %v440_v9  ;;  %vm448_vm6 = vweird.f32 %v689_v14  ;;  %517 = vmatpush.msrb.mxu1 %v496_v23  ;;  %v581_v9 = vld [vmem:[%s1174_s14] sm:$0xff] }
 0x2c9   :  { %vm449_vm8 = vmor %vm447_vm7, %vm448_vm6 }
 0x2ca   :  { %v443_v17 = vmul.f32 %v689_v14, %v442_v15  ;;  %518 = vmatpush.msrb.mxu1 %v495_v25 }
 0x2cc   :  { %v444_v19 = vmul.f32 0.5, %v443_v17  ;;  %519 = vmatpush.msrb.mxu1 %v494_v28 }
 0x2ce   :  { %v445_v22 = vsub.f32 1.5, %v444_v19  ;;  %520 = vmatpush.msrb.mxu1 %v493_v33 }
 0x2d0   :  { %v446_v24 = vmul.f32 %v689_v14, %v445_v22  ;;  %521 = vmatpush.msrb.mxu1 %v492_v37 }
 0x2d2   :  { %v450_v27 = vsel %vm449_vm8, %v689_v14, %v446_v24  ;;  %522 = vmatpush.msrb.mxu1 %v491_v40 }
 0x2d3   :  { %v453_v29 = vmul.f32 %v450_v27, %v427_v60  ;;  %v452_v31 = vmul.f32 %v450_v27, %v426_v59  ;;  %v451_v32 = vmul.f32 %v450_v27, %v425_v58 }
 0x2d4   :  { %523 = vmatpush.msrb.mxu1 %v490_v43 }
 0x2d5   :  { %v457_v34 = vmul.f32 %v680_v26, %v453_v29  ;;  %v456_v35 = vmul.f32 %v680_v26, %v452_v31  ;;  %v455_v36 = vmul.f32 %v680_v26, %v451_v32 }
 0x2d6   :  { %524 = vmatpush.msrb.mxu1 %v489_v47 }
 0x2d7   :  { %v1081_v38 = vadd.f32 %v681_v30, %v457_v34  ;;  %v1083_v39 = vadd.f32 %v681_v30, %v456_v35  ;;  %v1089_v42 = vadd.f32 %v681_v30, %v455_v36 }
 0x2d9   :  { %v464_v41 = vmax.f32 %v1081_v38, 0.0  ;;  %v463_v44 = vmax.f32 %v1083_v39, 0.0  ;;  %v462_v45 = vmax.f32 %v1089_v42, 0.0 }
 0x2db   :  { %482 = vmatpush.msrb.mxu0 %v464_v41 }
 0x2dd   :  { %483 = vmatpush.msrb.mxu0 %v463_v44 }
 0x2df   :  { %484 = vmatpush.msrb.mxu0 %v462_v45 }
 0x2e0   :  { %665 = vmatmul.msk.f32.vlgmr.msrb.gmra.mxu0 %vm80_vm0, %v465_v46  ;;  %vm630_vm0 = vcmask 97280  }
 0x35d   :  { %v486_v49 = vpop.f32.mrf.mxu0 }
 0x35e   :  { %525 = vmatmul.f32.vlgmr.msrb.gmra.mxu1 %v486_v49 }
 0x3db   :  { %v526_v54 = vpop.f32.mrf.mxu1 }
 0x3dc   :  { %v527_v55 = vadd.f32 %v682_v53, %v526_v54 }
 0x3de   :  { %v529_v56 = vmax.f32 %v527_v55, 0.0 }
 0x3e0   :  { %666 = vmatmul.msk.f32.vlgmr.msra.gmra.mxu2 %vm538_vm9, %v529_v56 }
 0x463   :  { %v559_v58 = vpop.f32.mrf.mxu2 }
 0x464   :  { %v560_v59 = vadd.f32 %v683_v57, %v559_v58 }
 0x466   :  { %v562_v60 = vsub.f32 0.0, %v560_v59 }
 0x468   :  { %v563_v1 = vmul.f32 1.442695, %v562_v60 }
 0x46a   :  { %690 = vpow2.f32 %v563_v1 }
 0x470   :  { %v691_v61 = vpop.eup %690 }
 0x471   :  { %v565_v62 = vadd.f32 1.0, %v691_v61 }
 0x473   :  { %692 = vrcp.f32 %v565_v62  ;;  %v577_v3 = vand.u32 2147483648, %v565_v62  ;;  %v575_v5 = vand.u32 2147483647, %v565_v62  ;;  %vm571_vm11 = vweird.f32 %v565_v62 }
 0x475   :  { %v578_v7 = vor.u32 1.1754944e-38, %v577_v3  ;;  %vm576_vm14 = vcmp.eq.f32.partialorder %v575_v5, 8.507059e+37 }
 0x479   :  { %v693_v4 = vpop.eup %692 }
 0x47a   :  { %v567_v63 = vmul.f32 %v693_v4, %v565_v62  ;;  %vm572_vm10 = vweird.f32 %v693_v4 }
 0x47b   :  { %vm573_vm12 = vmor %vm571_vm11, %vm572_vm10 }
 0x47c   :  { %v568_v2 = vsub.f32 1.0, %v567_v63 }
 0x47e   :  { %v569_v0 = vmul.f32 %v693_v4, %v568_v2 }
 0x480   :  { %v570_v6 = vadd.f32 %v693_v4, %v569_v0 }
 0x482   :  { %v574_v8 = vsel %vm573_vm12, %v693_v4, %v570_v6 }
 0x483   :  { %v579_v10 = vsel %vm576_vm14, %v578_v7, %v574_v8 }
 0x484   :  { %667 = vmatpush.msk.msra.mxu0 %vm594_vm13, %v579_v10 }
 0x485   :  { %668 = vmatmul.msk.f32.vlgmr.msra.gmra.mxu0 %vm584_vm15, %v581_v9 }
 0x48d   :  { %669 = vmatmul.msk.f32.gmra.mxu0 %vm584_vm15, %v582_v11 }
 0x495   :  { %670 = vmatmul.msk.f32.gmra.mxu0 %vm584_vm15, %v583_v12 }
 0x502   :  { %v615_v13 = vpop.f32.mrf.mxu0 }
 0x503   :  { %v627_v14 = vmul.f32 %v624_v20, %v615_v13 }
 0x505   :  { %v631_v15 = vsel %vm630_vm0, %v627_v14, 0.0 }
 0x506   :  { %632 = vadd.xlane.f32.xlu0 %v631_v15 }
 0x50a   :  { %v618_v17 = vpop.f32.mrf.mxu0 }
 0x50b   :  { %v628_v18 = vmul.f32 %v625_v16, %v618_v17 }
 0x50d   :  { %v634_v19 = vsel %vm630_vm0, %v628_v18, 0.0 }
 0x50e   :  { %635 = vadd.xlane.f32.xlu1 %v634_v19 }
 0x512   :  { %v621_v22 = vpop.f32.mrf.mxu0 }
 0x513   :  { %v629_v23 = vmul.f32 %v626_v21, %v621_v22 }
 0x515   :  { %v637_v24 = vsel %vm630_vm0, %v629_v23, 0.0 }
 0x516   :  { %638 = vadd.xlane.f32.xlu2 %v637_v24 }
 0x579   :  { %v633_v25 = vpop.xlane.xlu0 %632 }
 0x57a   :  { %v640_v26 = vadd.f32 1.0, %v633_v25 }
 0x57c   :  { %v643_v27 = vmul.f32 %v640_v26, %v462_v45 }
 0x57e   :  { %646 = vst [vmem:[%s1176_s16] sm:$0xff] %v643_v27 }
 0x581   :  { %v636_v28 = vpop.xlane.xlu1 %635 }
 0x582   :  { %v641_v29 = vadd.f32 1.0, %v636_v28 }
 0x584   :  { %v644_v30 = vmul.f32 %v641_v29, %v463_v44 }
 0x586   :  { %647 = vst [vmem:[%s1176_s16 + $0x8] sm:$0xff] %v644_v30 }
 0x589   :  { %v639_v31 = vpop.xlane.xlu2 %638 }
 0x58a   :  { %v642_v32 = vadd.f32 1.0, %v639_v31 }
 0x58c   :  { %v645_v33 = vmul.f32 %v642_v32, %v464_v41 }
 0x58e   :  { %648 = vst [vmem:[%s1176_s16 + $0x10] sm:$0xff] %v645_v33 }

</bundles_post_ra>
